<compile_context>
chip_gen: v7x
topology: tpu7x:2x2x1
jax: 0.10.0
libtpu: 0.0.40
codegen_flags: <defaults>
</compile_context>

<pallas_src>
import jax
import jax.numpy as jnp
from jax.experimental import pallas as pl
from jax.experimental.pallas import tpu as pltpu

BN_EPS = 1e-5
_LANE = 128
_SUBLANE = 8


def _round_up(x, m):
    return (x + m - 1) // m * m


# ---------------------------------------------------------------------------
# Kernel
# ---------------------------------------------------------------------------
def _mlp_kernel(x_ref, w_in_ref, b_in_ref, w_mid_ref, b_mid_ref,
                w_out_ref, b_out_ref, out_ref):
    """One batch tile through the whole (folded) MLP.

    x_ref    : (TB, F_pad)      bf16
    w_in_ref : (F_pad, 128)     bf16   b_in_ref : (1, 128)    f32
    w_mid_ref: (6, 128, 128)    bf16   b_mid_ref: (6, 1, 128) f32
    w_out_ref: (128, 128)       bf16   b_out_ref: (1, 128)    f32
    out_ref  : (TB, 128)        f32    (column 0 holds the result)
    """
    h = x_ref[...]  # bf16

    # Layer 1: F_pad -> 128 (64 real outputs, zero-padded)
    y = jnp.dot(h, w_in_ref[...], preferred_element_type=jnp.float32)
    h = jnp.maximum(y + b_in_ref[...], 0.0).astype(jnp.bfloat16)

    # Layers 2..7: six identical (padded) 128 -> 128 blocks, statically unrolled.
    for li in range(w_mid_ref.shape[0]):
        y = jnp.dot(h, w_mid_ref[li], preferred_element_type=jnp.float32)
        h = jnp.maximum(y + b_mid_ref[li], 0.0).astype(jnp.bfloat16)

    # Layer 8: 128 -> 1 (output zero-padded to 128 lanes for dense vst)
    y = jnp.dot(h, w_out_ref[...], preferred_element_type=jnp.float32)
    out_ref[...] = jnp.maximum(y + b_out_ref[...], 0.0)


# ---------------------------------------------------------------------------
# Wrapper
# ---------------------------------------------------------------------------
def neural_network_net_forward(x_nchw, packed, *, tb=128):
    """packed = (w_in, b_in, w_mid, b_mid, w_out, b_out) from fold_and_pad_params()."""
    assert tb % _SUBLANE == 0
    w_in, b_in, w_mid, b_mid, w_out, b_out = packed

    B = x_nchw.shape[0]
    x_flat = x_nchw.reshape(B, -1)
    F = x_flat.shape[1]

    f_pad = w_in.shape[0]          # padded input feature width
    out_pad = w_out.shape[1]       # padded output width (128)

    TB = tb if B >= tb else max(_SUBLANE, _round_up(B, _SUBLANE))
    B_pad = _round_up(B, TB)

    # Zero-pad batch rows / feature columns; cast input to bf16.
    x_p = jnp.zeros((B_pad, f_pad), jnp.bfloat16)
    x_p = x_p.at[:B, :F].set(x_flat.astype(jnp.bfloat16))

    grid = (B_pad // TB,)
    in_specs = [
        pl.BlockSpec((TB, f_pad), lambda i: (i, 0)),
        # Constant index_maps -> params stay resident across batch tiles.
        pl.BlockSpec(w_in.shape, lambda i: (0, 0)),
        pl.BlockSpec(b_in.shape, lambda i: (0, 0)),
        pl.BlockSpec(w_mid.shape, lambda i: (0, 0, 0)),
        pl.BlockSpec(b_mid.shape, lambda i: (0, 0, 0)),
        pl.BlockSpec(w_out.shape, lambda i: (0, 0)),
        pl.BlockSpec(b_out.shape, lambda i: (0, 0)),
    ]
    out_specs = pl.BlockSpec((TB, out_pad), lambda i: (i, 0))

    fn = pl.pallas_call(
        _mlp_kernel,
        out_shape=jax.ShapeDtypeStruct((B_pad, out_pad), jnp.float32),
        grid_spec=pltpu.PrefetchScalarGridSpec(
            num_scalar_prefetch=0,
            grid=grid,
            in_specs=in_specs,
            out_specs=out_specs,
        ),
        compiler_params=pltpu.CompilerParams(
            dimension_semantics=("parallel",),
        ),
    )
    out = fn(x_p, w_in, b_in, w_mid, b_mid, w_out, b_out)
    return out[:B, :1]


# ---------------------------------------------------------------------------
# Parameters (synthetic, PyTorch layout) + BN folding / padding
# ---------------------------------------------------------------------------
def init_params(key, num_of_inputs):
    """Raw PyTorch-like params: W (out,in), b (out,), BN (gamma,beta,mean,var)."""
    dims = [num_of_inputs, 64, 128, 128, 128, 128, 128, 128, 1]
    layers = []
    for li in range(8):
        d_in, d_out = dims[li], dims[li + 1]
        key, kw, kb, kg, kbe, km, kv = jax.random.split(key, 7)
        bound = 1.0 / jnp.sqrt(jnp.float32(d_in))
        w = jax.random.uniform(kw, (d_out, d_in), jnp.float32, -bound, bound)
        b = jax.random.uniform(kb, (d_out,), jnp.float32, -bound, bound)
        if li < 7:
            gamma = 1.0 + 0.1 * jax.random.normal(kg, (d_out,), jnp.float32)
            beta = 0.1 * jax.random.normal(kbe, (d_out,), jnp.float32)
            mean = 0.1 * jax.random.normal(km, (d_out,), jnp.float32)
            var = jnp.abs(jax.random.normal(kv, (d_out,), jnp.float32)) + 0.5
            layers.append((w, b, gamma, beta, mean, var))
        else:
            layers.append((w, b, None, None, None, None))
    return layers


def fold_and_pad_params(layers):
    """Fold eval-mode BN + bias into (W', b'), transpose to (in,out),
    zero-pad in/out dims to multiples of 128, cast weights to bf16, and stack
    the six identical 128x128 hidden layers into single tensors."""
    folded_f32 = []  # unpadded folded (W' (in,out), b' (out,)) for the reference
    padded = []
    for (w, b, gamma, beta, mean, var) in layers:
        d_out, d_in = w.shape
        wt = w.T  # (in, out)
        if gamma is not None:
            scale = gamma / jnp.sqrt(var + BN_EPS)
            shift = beta - mean * scale
            wt = wt * scale[None, :]
            bb = b * scale + shift
        else:
            bb = b
        folded_f32.append((wt, bb))
        in_pad = _round_up(d_in, _LANE)
        out_pad = _round_up(d_out, _LANE)
        w_p = (jnp.zeros((in_pad, out_pad), jnp.float32)
               .at[:d_in, :d_out].set(wt)).astype(jnp.bfloat16)
        b_p = jnp.zeros((1, out_pad), jnp.float32).at[0, :d_out].set(bb)
        padded.append((w_p, b_p))

    w_in, b_in = padded[0]
    w_mid = jnp.stack([padded[i][0] for i in range(1, 7)])   # (6, 128, 128) bf16
    b_mid = jnp.stack([padded[i][1] for i in range(1, 7)])   # (6, 1, 128)  f32
    w_out, b_out = padded[7]
    packed = (w_in, b_in, w_mid, b_mid, w_out, b_out)
    return packed, folded_f32


# ---------------------------------------------------------------------------
# References
# ---------------------------------------------------------------------------
def reference_folded_bf16(x_nchw, folded_f32):
    """Same math as the kernel (folded bf16 weights, f32 accumulation)."""
    h = x_nchw.reshape(x_nchw.shape[0], -1).astype(jnp.bfloat16)
    n = len(folded_f32)
    for li, (wt, bb) in enumerate(folded_f32):
        y = jnp.dot(h, wt.astype(jnp.bfloat16),
                    preferred_element_type=jnp.float32) + bb[None, :]
        y = jnp.maximum(y, 0.0)
        h = y.astype(jnp.bfloat16) if li + 1 < n else y
    return h


def reference_eval_f32(x_nchw, layers):
    """True eval-mode module semantics in f32 (Linear -> BN(running) -> ReLU)."""
    h = x_nchw.reshape(x_nchw.shape[0], -1).astype(jnp.float32)
    for (w, b, gamma, beta, mean, var) in layers:
        h = h @ w.T + b[None, :]
        if gamma is not None:
            h = (h - mean[None, :]) / jnp.sqrt(var[None, :] + BN_EPS)
            h = h * gamma[None, :] + beta[None, :]
        h = jnp.maximum(h, 0.0)  # Dropout(0.1) is identity in eval mode
    return h


# ---------------------------------------------------------------------------
if __name__ == "__main__":
    key = jax.random.PRNGKey(0)
    key, kx, kp = jax.random.split(key, 3)

    # Small NCHW input; Flatten gives num_of_inputs = 4*8*8 = 256 features.
    B, C, H, W = 16, 4, 8, 8
    x = jax.random.normal(kx, (B, C, H, W), jnp.float32)

    layers = init_params(kp, C * H * W)
    packed, folded = fold_and_pad_params(layers)

    # tb=8 -> batch grid of 2 tiles (exercises the pipelined / parallel grid).
    out = neural_network_net_forward(x, packed, tb=8)
    out = jax.block_until_ready(out)
    assert out.shape == (B, 1), out.shape

    ref_bf16 = reference_folded_bf16(x, folded)
    ref_f32 = reference_eval_f32(x, layers)
    assert jnp.allclose(out, ref_bf16, atol=5e-3, rtol=5e-3), (
        float(jnp.max(jnp.abs(out - ref_bf16)))
    )
    assert jnp.allclose(out, ref_f32, atol=1e-1, rtol=1e-1), (
        float(jnp.max(jnp.abs(out - ref_f32)))
    )
    print("KERNEL_OK")
</pallas_src>

<mosaic_0001>
module attributes {stable_mosaic.version = 11 : i64} {
  func.func @_mlp_kernel(%arg0: i32, %arg1: memref<8x256xbf16, #tpu.memory_space<vmem>>, %arg2: memref<256x128xbf16, #tpu.memory_space<vmem>>, %arg3: memref<1x128xf32, #tpu.memory_space<vmem>>, %arg4: memref<6x128x128xbf16, #tpu.memory_space<vmem>>, %arg5: memref<6x1x128xf32, #tpu.memory_space<vmem>>, %arg6: memref<128x128xbf16, #tpu.memory_space<vmem>>, %arg7: memref<1x128xf32, #tpu.memory_space<vmem>>, %arg8: memref<8x128xf32, #tpu.memory_space<vmem>>) attributes {dimension_semantics = [#tpu.dimension_semantics<parallel>], iteration_bounds = array<i64: 2>, scalar_prefetch = 0 : i64, scratch_operands = 0 : i64, tpu.core_type = #tpu.core_type<tc>, window_params = [{transform_indices = @transform_0, window_bounds = array<i64: 8, 256>}, {pipeline_mode = #tpu.pipeline_mode<synchronous>, transform_indices = @transform_1, window_bounds = array<i64: 256, 128>}, {pipeline_mode = #tpu.pipeline_mode<synchronous>, transform_indices = @transform_2, window_bounds = array<i64: 1, 128>}, {pipeline_mode = #tpu.pipeline_mode<synchronous>, transform_indices = @transform_3, window_bounds = array<i64: 6, 128, 128>}, {pipeline_mode = #tpu.pipeline_mode<synchronous>, transform_indices = @transform_4, window_bounds = array<i64: 6, 1, 128>}, {pipeline_mode = #tpu.pipeline_mode<synchronous>, transform_indices = @transform_5, window_bounds = array<i64: 128, 128>}, {pipeline_mode = #tpu.pipeline_mode<synchronous>, transform_indices = @transform_6, window_bounds = array<i64: 1, 128>}, {transform_indices = @transform_7, window_bounds = array<i64: 8, 128>}]} {
    %c0 = arith.constant 0 : index
    %c0_0 = arith.constant 0 : index
    %0 = vector.load %arg1[%c0, %c0_0] : memref<8x256xbf16, #tpu.memory_space<vmem>>, vector<8x256xbf16>
    %c0_1 = arith.constant 0 : index
    %c0_2 = arith.constant 0 : index
    %1 = vector.load %arg2[%c0_1, %c0_2] : memref<256x128xbf16, #tpu.memory_space<vmem>>, vector<256x128xbf16>
    %cst = arith.constant dense<0.000000e+00> : vector<8x128xf32>
    %2 = tpu.matmul %0, %1, %cst {dimension_numbers = #tpu.dot_dimension_numbers<[1], [0], [0], [1], [0, 0, 1, 1], [], []>} : vector<8x256xbf16>, vector<256x128xbf16>, vector<8x128xf32> -> vector<8x128xf32>
    %c0_3 = arith.constant 0 : index
    %c0_4 = arith.constant 0 : index
    %3 = vector.load %arg3[%c0_3, %c0_4] : memref<1x128xf32, #tpu.memory_space<vmem>>, vector<1x128xf32>
    %4 = vector.broadcast %3 : vector<1x128xf32> to vector<8x128xf32>
    %5 = arith.addf %2, %4 : vector<8x128xf32>
    %cst_5 = arith.constant 0.000000e+00 : f32
    %6 = vector.broadcast %cst_5 : f32 to vector<8x128xf32>
    %7 = arith.maximumf %5, %6 : vector<8x128xf32>
    %8 = arith.truncf %7 : vector<8x128xf32> to vector<8x128xbf16>
    %c0_6 = arith.constant 0 : index
    %c0_7 = arith.constant 0 : index
    %c0_8 = arith.constant 0 : index
    %9 = vector.load %arg4[%c0_6, %c0_7, %c0_8] : memref<6x128x128xbf16, #tpu.memory_space<vmem>>, vector<1x128x128xbf16>
    %10 = vector.shape_cast %9 : vector<1x128x128xbf16> to vector<128x128xbf16>
    %cst_9 = arith.constant dense<0.000000e+00> : vector<8x128xf32>
    %11 = tpu.matmul %8, %10, %cst_9 {dimension_numbers = #tpu.dot_dimension_numbers<[1], [0], [0], [1], [0, 0, 1, 1], [], []>} : vector<8x128xbf16>, vector<128x128xbf16>, vector<8x128xf32> -> vector<8x128xf32>
    %c0_10 = arith.constant 0 : index
    %c0_11 = arith.constant 0 : index
    %c0_12 = arith.constant 0 : index
    %12 = vector.load %arg5[%c0_10, %c0_11, %c0_12] : memref<6x1x128xf32, #tpu.memory_space<vmem>>, vector<1x1x128xf32>
    %13 = vector.shape_cast %12 : vector<1x1x128xf32> to vector<1x128xf32>
    %14 = vector.broadcast %13 : vector<1x128xf32> to vector<8x128xf32>
    %15 = arith.addf %11, %14 : vector<8x128xf32>
    %cst_13 = arith.constant 0.000000e+00 : f32
    %16 = vector.broadcast %cst_13 : f32 to vector<8x128xf32>
    %17 = arith.maximumf %15, %16 : vector<8x128xf32>
    %18 = arith.truncf %17 : vector<8x128xf32> to vector<8x128xbf16>
    %c1 = arith.constant 1 : index
    %c0_14 = arith.constant 0 : index
    %c0_15 = arith.constant 0 : index
    %19 = vector.load %arg4[%c1, %c0_14, %c0_15] : memref<6x128x128xbf16, #tpu.memory_space<vmem>>, vector<1x128x128xbf16>
    %20 = vector.shape_cast %19 : vector<1x128x128xbf16> to vector<128x128xbf16>
    %cst_16 = arith.constant dense<0.000000e+00> : vector<8x128xf32>
    %21 = tpu.matmul %18, %20, %cst_16 {dimension_numbers = #tpu.dot_dimension_numbers<[1], [0], [0], [1], [0, 0, 1, 1], [], []>} : vector<8x128xbf16>, vector<128x128xbf16>, vector<8x128xf32> -> vector<8x128xf32>
    %c1_17 = arith.constant 1 : index
    %c0_18 = arith.constant 0 : index
    %c0_19 = arith.constant 0 : index
    %22 = vector.load %arg5[%c1_17, %c0_18, %c0_19] : memref<6x1x128xf32, #tpu.memory_space<vmem>>, vector<1x1x128xf32>
    %23 = vector.shape_cast %22 : vector<1x1x128xf32> to vector<1x128xf32>
    %24 = vector.broadcast %23 : vector<1x128xf32> to vector<8x128xf32>
    %25 = arith.addf %21, %24 : vector<8x128xf32>
    %cst_20 = arith.constant 0.000000e+00 : f32
    %26 = vector.broadcast %cst_20 : f32 to vector<8x128xf32>
    %27 = arith.maximumf %25, %26 : vector<8x128xf32>
    %28 = arith.truncf %27 : vector<8x128xf32> to vector<8x128xbf16>
    %c2 = arith.constant 2 : index
    %c0_21 = arith.constant 0 : index
    %c0_22 = arith.constant 0 : index
    %29 = vector.load %arg4[%c2, %c0_21, %c0_22] : memref<6x128x128xbf16, #tpu.memory_space<vmem>>, vector<1x128x128xbf16>
    %30 = vector.shape_cast %29 : vector<1x128x128xbf16> to vector<128x128xbf16>
    %cst_23 = arith.constant dense<0.000000e+00> : vector<8x128xf32>
    %31 = tpu.matmul %28, %30, %cst_23 {dimension_numbers = #tpu.dot_dimension_numbers<[1], [0], [0], [1], [0, 0, 1, 1], [], []>} : vector<8x128xbf16>, vector<128x128xbf16>, vector<8x128xf32> -> vector<8x128xf32>
    %c2_24 = arith.constant 2 : index
    %c0_25 = arith.constant 0 : index
    %c0_26 = arith.constant 0 : index
    %32 = vector.load %arg5[%c2_24, %c0_25, %c0_26] : memref<6x1x128xf32, #tpu.memory_space<vmem>>, vector<1x1x128xf32>
    %33 = vector.shape_cast %32 : vector<1x1x128xf32> to vector<1x128xf32>
    %34 = vector.broadcast %33 : vector<1x128xf32> to vector<8x128xf32>
    %35 = arith.addf %31, %34 : vector<8x128xf32>
    %cst_27 = arith.constant 0.000000e+00 : f32
    %36 = vector.broadcast %cst_27 : f32 to vector<8x128xf32>
    %37 = arith.maximumf %35, %36 : vector<8x128xf32>
    %38 = arith.truncf %37 : vector<8x128xf32> to vector<8x128xbf16>
    %c3 = arith.constant 3 : index
    %c0_28 = arith.constant 0 : index
    %c0_29 = arith.constant 0 : index
    %39 = vector.load %arg4[%c3, %c0_28, %c0_29] : memref<6x128x128xbf16, #tpu.memory_space<vmem>>, vector<1x128x128xbf16>
    %40 = vector.shape_cast %39 : vector<1x128x128xbf16> to vector<128x128xbf16>
    %cst_30 = arith.constant dense<0.000000e+00> : vector<8x128xf32>
    %41 = tpu.matmul %38, %40, %cst_30 {dimension_numbers = #tpu.dot_dimension_numbers<[1], [0], [0], [1], [0, 0, 1, 1], [], []>} : vector<8x128xbf16>, vector<128x128xbf16>, vector<8x128xf32> -> vector<8x128xf32>
    %c3_31 = arith.constant 3 : index
    %c0_32 = arith.constant 0 : index
    %c0_33 = arith.constant 0 : index
    %42 = vector.load %arg5[%c3_31, %c0_32, %c0_33] : memref<6x1x128xf32, #tpu.memory_space<vmem>>, vector<1x1x128xf32>
    %43 = vector.shape_cast %42 : vector<1x1x128xf32> to vector<1x128xf32>
    %44 = vector.broadcast %43 : vector<1x128xf32> to vector<8x128xf32>
    %45 = arith.addf %41, %44 : vector<8x128xf32>
    %cst_34 = arith.constant 0.000000e+00 : f32
    %46 = vector.broadcast %cst_34 : f32 to vector<8x128xf32>
    %47 = arith.maximumf %45, %46 : vector<8x128xf32>
    %48 = arith.truncf %47 : vector<8x128xf32> to vector<8x128xbf16>
    %c4 = arith.constant 4 : index
    %c0_35 = arith.constant 0 : index
    %c0_36 = arith.constant 0 : index
    %49 = vector.load %arg4[%c4, %c0_35, %c0_36] : memref<6x128x128xbf16, #tpu.memory_space<vmem>>, vector<1x128x128xbf16>
    %50 = vector.shape_cast %49 : vector<1x128x128xbf16> to vector<128x128xbf16>
    %cst_37 = arith.constant dense<0.000000e+00> : vector<8x128xf32>
    %51 = tpu.matmul %48, %50, %cst_37 {dimension_numbers = #tpu.dot_dimension_numbers<[1], [0], [0], [1], [0, 0, 1, 1], [], []>} : vector<8x128xbf16>, vector<128x128xbf16>, vector<8x128xf32> -> vector<8x128xf32>
    %c4_38 = arith.constant 4 : index
    %c0_39 = arith.constant 0 : index
    %c0_40 = arith.constant 0 : index
    %52 = vector.load %arg5[%c4_38, %c0_39, %c0_40] : memref<6x1x128xf32, #tpu.memory_space<vmem>>, vector<1x1x128xf32>
    %53 = vector.shape_cast %52 : vector<1x1x128xf32> to vector<1x128xf32>
    %54 = vector.broadcast %53 : vector<1x128xf32> to vector<8x128xf32>
    %55 = arith.addf %51, %54 : vector<8x128xf32>
    %cst_41 = arith.constant 0.000000e+00 : f32
    %56 = vector.broadcast %cst_41 : f32 to vector<8x128xf32>
    %57 = arith.maximumf %55, %56 : vector<8x128xf32>
    %58 = arith.truncf %57 : vector<8x128xf32> to vector<8x128xbf16>
    %c5 = arith.constant 5 : index
    %c0_42 = arith.constant 0 : index
    %c0_43 = arith.constant 0 : index
    %59 = vector.load %arg4[%c5, %c0_42, %c0_43] : memref<6x128x128xbf16, #tpu.memory_space<vmem>>, vector<1x128x128xbf16>
    %60 = vector.shape_cast %59 : vector<1x128x128xbf16> to vector<128x128xbf16>
    %cst_44 = arith.constant dense<0.000000e+00> : vector<8x128xf32>
    %61 = tpu.matmul %58, %60, %cst_44 {dimension_numbers = #tpu.dot_dimension_numbers<[1], [0], [0], [1], [0, 0, 1, 1], [], []>} : vector<8x128xbf16>, vector<128x128xbf16>, vector<8x128xf32> -> vector<8x128xf32>
    %c5_45 = arith.constant 5 : index
    %c0_46 = arith.constant 0 : index
    %c0_47 = arith.constant 0 : index
    %62 = vector.load %arg5[%c5_45, %c0_46, %c0_47] : memref<6x1x128xf32, #tpu.memory_space<vmem>>, vector<1x1x128xf32>
    %63 = vector.shape_cast %62 : vector<1x1x128xf32> to vector<1x128xf32>
    %64 = vector.broadcast %63 : vector<1x128xf32> to vector<8x128xf32>
    %65 = arith.addf %61, %64 : vector<8x128xf32>
    %cst_48 = arith.constant 0.000000e+00 : f32
    %66 = vector.broadcast %cst_48 : f32 to vector<8x128xf32>
    %67 = arith.maximumf %65, %66 : vector<8x128xf32>
    %68 = arith.truncf %67 : vector<8x128xf32> to vector<8x128xbf16>
    %c0_49 = arith.constant 0 : index
    %c0_50 = arith.constant 0 : index
    %69 = vector.load %arg6[%c0_49, %c0_50] : memref<128x128xbf16, #tpu.memory_space<vmem>>, vector<128x128xbf16>
    %cst_51 = arith.constant dense<0.000000e+00> : vector<8x128xf32>
    %70 = tpu.matmul %68, %69, %cst_51 {dimension_numbers = #tpu.dot_dimension_numbers<[1], [0], [0], [1], [0, 0, 1, 1], [], []>} : vector<8x128xbf16>, vector<128x128xbf16>, vector<8x128xf32> -> vector<8x128xf32>
    %c0_52 = arith.constant 0 : index
    %c0_53 = arith.constant 0 : index
    %71 = vector.load %arg7[%c0_52, %c0_53] : memref<1x128xf32, #tpu.memory_space<vmem>>, vector<1x128xf32>
    %72 = vector.broadcast %71 : vector<1x128xf32> to vector<8x128xf32>
    %73 = arith.addf %70, %72 : vector<8x128xf32>
    %cst_54 = arith.constant 0.000000e+00 : f32
    %74 = vector.broadcast %cst_54 : f32 to vector<8x128xf32>
    %75 = arith.maximumf %73, %74 : vector<8x128xf32>
    %c0_55 = arith.constant 0 : index
    %c0_56 = arith.constant 0 : index
    %76 = vector.load %arg8[%c0_55, %c0_56] : memref<8x128xf32, #tpu.memory_space<vmem>>, vector<8x128xf32>
    tpu.vector_store %arg8[%c0_55, %c0_56], %75 {strides = array<i32>} : memref<8x128xf32, #tpu.memory_space<vmem>>, vector<8x128xf32>,
    return
  }
  func.func @transform_0(%arg0: i32) -> (i32, i32) {
    %c0_i32 = arith.constant 0 : i32
    %c0_i32_0 = arith.constant 0 : i32
    return %arg0, %c0_i32 : i32, i32
  }
  func.func @transform_1(%arg0: i32) -> (i32, i32) {
    %c0_i32 = arith.constant 0 : i32
    %c0_i32_0 = arith.constant 0 : i32
    %c0_i32_1 = arith.constant 0 : i32
    return %c0_i32, %c0_i32_0 : i32, i32
  }
  func.func @transform_2(%arg0: i32) -> (i32, i32) {
    %c0_i32 = arith.constant 0 : i32
    %c0_i32_0 = arith.constant 0 : i32
    %c0_i32_1 = arith.constant 0 : i32
    return %c0_i32, %c0_i32_0 : i32, i32
  }
  func.func @transform_3(%arg0: i32) -> (i32, i32, i32) {
    %c0_i32 = arith.constant 0 : i32
    %c0_i32_0 = arith.constant 0 : i32
    %c0_i32_1 = arith.constant 0 : i32
    %c0_i32_2 = arith.constant 0 : i32
    return %c0_i32, %c0_i32_0, %c0_i32_1 : i32, i32, i32
  }
  func.func @transform_4(%arg0: i32) -> (i32, i32, i32) {
    %c0_i32 = arith.constant 0 : i32
    %c0_i32_0 = arith.constant 0 : i32
    %c0_i32_1 = arith.constant 0 : i32
    %c0_i32_2 = arith.constant 0 : i32
    return %c0_i32, %c0_i32_0, %c0_i32_1 : i32, i32, i32
  }
  func.func @transform_5(%arg0: i32) -> (i32, i32) {
    %c0_i32 = arith.constant 0 : i32
    %c0_i32_0 = arith.constant 0 : i32
    %c0_i32_1 = arith.constant 0 : i32
    return %c0_i32, %c0_i32_0 : i32, i32
  }
  func.func @transform_6(%arg0: i32) -> (i32, i32) {
    %c0_i32 = arith.constant 0 : i32
    %c0_i32_0 = arith.constant 0 : i32
    %c0_i32_1 = arith.constant 0 : i32
    return %c0_i32, %c0_i32_0 : i32, i32
  }
  func.func @transform_7(%arg0: i32) -> (i32, i32) {
    %c0_i32 = arith.constant 0 : i32
    %c0_i32_0 = arith.constant 0 : i32
    return %arg0, %c0_i32 : i32, i32
  }
}

</mosaic_0001>

<bundles_post_ra>
// kernel: tpu_custom_call.1
= control target key start
LH: loop header
LB: loop body
LE: loop exit
PB: predicated region body
PF: predicated region fallthrough
CT: control target
= control target key end

     0   :  { %12 = vsyncpa [#allocation3], 0  ;;  %s2526_s0 = inlined_call_operand.hbm [shape: bf16[16,256], index: 0, kind: input, shape index: {}]   ;;  %s2527_s1 = inlined_call_operand.hbm [shape: bf16[256,128], index: 1, kind: input, shape index: {}]   ;;  %s2528_s2 = inlined_call_operand.vmem [shape: f32[1,128], index: 2, kind: input, shape index: {}]   ;;  %s2529_s3 = inlined_call_operand.hbm [shape: bf16[6,128,128], index: 3, kind: input, shape index: {}]   ;;  %s2530_s4 = inlined_call_operand.vmem [shape: f32[6,1,128], index: 4, kind: input, shape index: {}]   ;;  %s2531_s5 = inlined_call_operand.hbm [shape: bf16[128,128], index: 5, kind: input, shape index: {}]   ;;  %s2532_s6 = inlined_call_operand.vmem [shape: f32[1,128], index: 6, kind: input, shape index: {}]   ;;  %s2533_s7 = inlined_call_operand.hbm [shape: f32[16,128], index: 7, kind: output, shape index: {}]  }
   0x1   :  { %14 = vsyncpa [#allocation3 + $0x1], 0 }
   0x2   :  { %15 = vsyncpa [#allocation6], 0 }
   0x3   :  { %16 = vsyncpa [#allocation9], 0 }
   0x4   :  { %17 = vsyncpa [#allocation4], 0 }
   0x5   :  { %19 = vsyncpa [#allocation4 + $0x1], 0  ;;  %s2165_s24 = smov 0   ;;  %s2167_s25 = smov 0  }
   0x6   :  { %s2169_s26 = smov 0   ;;  %s2171_s27 = smov 0  }
   0x7 LB: > { %s2186_s28 = sadd.s32 4294967295, %s2114_s27   ;;  %s1439_s29 = sadd.s32 4294967294, %s2114_s27   ;;  %s2114_s27 = sphi %s2171_s27, %s2559_s27   ;;  %s2110_s26 = sphi %s2169_s26, %s2558_s26   ;;  %s2106_s25 = sphi %s2167_s25, %s2557_s25   ;;  %s2102_s24 = sphi %s2165_s24, %s2556_s24  }
   0x8   : > { %p45_p0 = scmp.ne.s32.totalorder %s2106_s25, %s2102_s24  ;;  %p2534_p1 = scmp.eq.s32.totalorder %s2186_s28, 0 }
   0x9   : > { %p201_p3 = scmp.eq.s32.totalorder %s1439_s29, 1  ;;  %p1440_p5 = scmp.ge.s32.totalorder %s2114_s27, 1 }
   0xa   : > { %p2195_p4 = por %p2534_p1, %p45_p0  ;;  %p208_p7 = scmp.lt.s32.totalorder %s2114_s27, 3 }
   0xb   : > { %p2200_p6 = por %p201_p3, %p45_p0  ;;  %s2116_s10 = smov [#allocation5]  }
   0xc   : > { %s2538_s30 = scalar_select %p2195_p4, 1, 0 }
   0xd   : > { %s2539_s8 = scalar_select %p2200_p6, 1, 0 }
   0xe   : > { %p2205_p8 = pnand %p1440_p5, %p208_p7  ;;  %s220_s11 = sshll.u32 %s2116_s10, 4  ;;  %s2209_s11 = int_to_ptr.vmem [resolvable:$true] %s220_s11 }
   0xf   : > { %2540 = sst [smem:[#allocation15_spill]] %s2539_s8  ;;  %s2117_s13 = smov [#allocation7]  }
  0x10   : > { %s2541_s9 = scalar_select %p2205_p8, 1, 0 }
  0x11   : > { %p1787_p9 = pneg %p2205_p8  ;;  %s236_s14 = sshll.u32 %s2117_s13, 4  ;;  %s2220_s14 = int_to_ptr.vmem [resolvable:$true] %s236_s14 }
  0x12   : > { %s2118_s15 = smov [#allocation8]   ;;  %s1926_s19 = scalar_lea.hbm %s2527_s1, 2048 }
  0x13   : > { %p2216_p11 = pnand %p1787_p9, %p2534_p1  ;;  %s2222_s16 = sshll.u32 %s2118_s15, 4  ;;  %s253_s16 = int_to_ptr.vmem [resolvable:$true] %s2222_s16 }
  0x14   : > { %p1927_p12 = scmp.ne.s32.totalorder %s2527_s1, %s1926_s19  ;;  %p1933_p5 = scmp.lt.u32.totalorder %s1926_s19, %s2527_s1 }
  0x15   : > { %p2232_p13 = pneg %p2216_p11 }
  0x17   : > { %p1929_p0 = pnand %p2232_p13, %p1927_p12 }
  0x19   : > { %p1930_p3 = pneg %p1929_p0 }
  0x1b   : > { %p1935_p7 = pnand %p1933_p5, %p1930_p3 }
  0x1d   : > { %1938 = shalt.err (!%p1935_p7)
}
  0x1e   : > { %s1939_s10 = scalar_lea.vmem %s2209_s11, 2048  ;;  %p1947_p2 = scmp.lt.s32.totalorder %s2209_s11, %s2209_s11 }
  0x1f   : > { %p1940_p9 = scmp.ne.s32.totalorder %s2209_s11, %s1939_s10  ;;  %p1948_p6 = scmp.lt.s32.totalorder %s1939_s10, %s1939_s10 }
  0x21   : > { %p1942_p10 = pnand %p1940_p9, %p2232_p13  ;;  %p1949_p12 = por %p1948_p6, %p1947_p2 }
  0x23   : > { %p1943_p1 = pneg %p1942_p10 }
  0x25   : > { %p1950_p0 = pnand %p1949_p12, %p1943_p1 }
  0x27   : > { %1953 = shalt.err (!%p1950_p0)
}
  0x28   : > { %s2119_s13 = smov 64   ;;  %s2120_s15 = smov 4  }
  0x29   : > { %1790 = dma.hbm_to_vmem [thread:$0]  (!%p2216_p11), %s2527_s1, 2048, %s2209_s11, [#allocation6], %s2119_s13, %s2119_s13, %s2120_s15  }
  0x2a   : > { %s1954_s21 = scalar_lea.hbm %s2529_s3, 6144 }
  0x2b   : > { %p1955_p1 = scmp.ne.s32.totalorder %s2529_s3, %s1954_s21  ;;  %p1961_p10 = scmp.lt.u32.totalorder %s1954_s21, %s2529_s3 }
  0x2d   : > { %p1957_p2 = pnand %p1955_p1, %p2232_p13 }
  0x2f   : > { %p1958_p6 = pneg %p1957_p2 }
  0x31   : > { %p1963_p3 = pnand %p1961_p10, %p1958_p6 }
  0x33   : > { %1966 = shalt.err (!%p1963_p3)
}
  0x34   : > { %s1967_s11 = scalar_lea.vmem %s2220_s14, 6144  ;;  %p1975_p12 = scmp.lt.s32.totalorder %s2220_s14, %s2220_s14 }
  0x35   : > { %p1968_p5 = scmp.ne.s32.totalorder %s2220_s14, %s1967_s11  ;;  %p1976_p0 = scmp.lt.s32.totalorder %s1967_s11, %s1967_s11 }
  0x37   : > { %p1970_p7 = pnand %p1968_p5, %p2232_p13  ;;  %p1977_p1 = por %p1976_p0, %p1975_p12 }
  0x39   : > { %p1971_p9 = pneg %p1970_p7 }
  0x3b   : > { %p1978_p2 = pnand %p1977_p1, %p1971_p9 }
  0x3d   : > { %1981 = shalt.err (!%p1978_p2)
}
  0x3e   : > { %1793 = dma.hbm_to_vmem [thread:$0]  (!%p2216_p11), %s2529_s3, 6144, %s2220_s14, [#allocation6], %s2119_s13, %s2119_s13, %s2120_s15  }
  0x3f   : > { %s1982_s20 = scalar_lea.hbm %s2531_s5, 1024 }
  0x40   : > { %p1983_p6 = scmp.ne.s32.totalorder %s2531_s5, %s1982_s20  ;;  %p1989_p5 = scmp.lt.u32.totalorder %s1982_s20, %s2531_s5 }
  0x42   : > { %p1985_p10 = pnand %p1983_p6, %p2232_p13 }
  0x44   : > { %p1986_p3 = pneg %p1985_p10 }
  0x46   : > { %p1991_p7 = pnand %p1989_p5, %p1986_p3 }
  0x48   : > { %1994 = shalt.err (!%p1991_p7)
}
  0x49   : > { %s1995_s11 = scalar_lea.vmem %s253_s16, 1024  ;;  %p2003_p1 = scmp.lt.s32.totalorder %s253_s16, %s253_s16 }
  0x4a   : > { %p1996_p9 = scmp.ne.s32.totalorder %s253_s16, %s1995_s11  ;;  %p2004_p2 = scmp.lt.s32.totalorder %s1995_s11, %s1995_s11 }
  0x4c   : > { %p1998_p12 = pnand %p1996_p9, %p2232_p13  ;;  %p2005_p4 = por %p2004_p2, %p2003_p1 }
  0x4e   : > { %p1999_p0 = pneg %p1998_p12 }
  0x50   : > { %p2006_p8 = pnand %p2005_p4, %p1999_p0 }
  0x52   : > { %2009 = shalt.err (!%p2006_p8)
}
  0x53   : > { %1796 = dma.hbm_to_vmem [thread:$0]  (!%p2216_p11), %s2531_s5, 1024, %s253_s16, [#allocation9], %s2119_s13, %s2119_s13, %s2120_s15  }
  0x54   : > { %s2305_s22 = sadd.s32 1, %s2114_s27   ;;  %s32_s17 = sadd.s32 1, %s2110_s26 }
  0x55   : > { %s29_s12 = ssub.s32 %s2114_s27, %s2305_s22  ;;  %p39_p8 = scmp.ne.s32.totalorder %s2110_s26, %s2106_s25 }
  0x56   : > { %p30_p4 = scmp.eq.s32.totalorder %s29_s12, 0  ;;  %p40_p13 = scmp.eq.s32.totalorder %s2114_s27, 0 }
  0x57   : > { %p1808_p6 = scmp.lt.s32.totalorder %s2114_s27, 2  ;;  %p2544_p3 = scmp.eq.s32.totalorder %s2186_s28, 1 }
  0x58   : > { %s2315_s18 = scalar_select %p30_p4, %s2110_s26, %s32_s17  }
  0x59   : > { %p41_p10 = por %p40_p13, %p39_p8  ;;  %p2319_p5 = por %p2544_p3, %p39_p8 }
  0x5a   : > { %s269_s20 = sand.u32 1, %s2110_s26   ;;  %s1545_s21 = sshll.u32 %s2114_s27, 7 }
  0x5b   : > { %s1445_s16 = sshll.u32 %s269_s20, 3  ;;  %s2328_s23 = scalar_lea.hbm %s2526_s0, %s1545_s21 }
  0x5c   : > { %s273_s29 = scalar_lea.vmem [#allocation2], %s1445_s16  ;;  %p2330_p11 = pnand %p1808_p6, %p41_p10 }
  0x5d   : > { %s281_s10 = sshll.u32 %s273_s29, 4  ;;  %s270_s14 = scalar_lea.sflag [#allocation3], %s269_s20  ;;  %s2334_s10 = int_to_ptr.vmem [resolvable:$true] %s281_s10 }
  0x5e   : > { %s2010_s8 = scalar_lea.hbm %s2328_s23, 128  ;;  %p2012_p9 = pneg %p2330_p11 }
  0x5f   : > { %p2011_p7 = scmp.ne.s32.totalorder %s2328_s23, %s2010_s8  ;;  %s2015_s21 = scalar_lea.hbm %s2526_s0, 256 }
  0x60   : > { %p2016_p1 = scmp.lt.u32.totalorder %s2328_s23, %s2526_s0  ;;  %p2017_p2 = scmp.lt.u32.totalorder %s2015_s21, %s2010_s8 }
  0x61   : > { %p2013_p12 = pnand %p2012_p9, %p2011_p7  ;;  %p2019_p8 = scmp.lt.u32.totalorder %s2010_s8, %s2328_s23 }
  0x62   : > { %p2018_p4 = por %p2017_p2, %p2016_p1 }
  0x63   : > { %p2014_p0 = pneg %p2013_p12 }
  0x64   : > { %p2020_p13 = por %p2019_p8, %p2018_p4 }
  0x66   : > { %p2021_p6 = pnand %p2020_p13, %p2014_p0 }
  0x68   : > { %2024 = shalt.err (!%p2021_p6)
}
  0x69   : > { %s2025_s20 = scalar_lea.vmem %s2334_s10, 128  ;;  %s2121_s15 = smov [#allocation2]  }
  0x6a   : > { %p2026_p10 = scmp.ne.s32.totalorder %s2334_s10, %s2025_s20  ;;  %s2030_s29 = sshll.u32 %s2121_s15, 4  ;;  %s2031_s29 = int_to_ptr.vmem [resolvable:$false] %s2030_s29 }
  0x6b   : > { %s2032_s12 = scalar_lea.vmem %s2031_s29, 256  ;;  %p2033_p12 = scmp.lt.s32.totalorder %s2334_s10, %s2031_s29 }
  0x6c   : > { %p2028_p3 = pnand %p2026_p10, %p2012_p9  ;;  %p2034_p1 = scmp.lt.s32.totalorder %s2032_s12, %s2025_s20 }
  0x6e   : > { %p2029_p7 = pneg %p2028_p3  ;;  %p2035_p2 = por %p2034_p1, %p2033_p12 }
  0x70   : > { %p2036_p4 = pnand %p2035_p2, %p2029_p7 }
  0x72   : > { %2039 = shalt.err (!%p2036_p4)
}
  0x73   : > { %1800 = dma.hbm_to_vmem [thread:$0]  (!%p2330_p11), %s2328_s23, 128, %s2334_s10, %s270_s14  }
  0x74   : > { %p2547_p0 = scmp.ne.s32.totalorder %s2541_s9, 0 }
  0x75   : > { %s2364_s8 = sand.u32 (!%p2547_p0), 1, %s2106_s25   ;;  %p2548_p9 = scmp.ne.s32.totalorder (!%p2547_p0), %s2538_s30, 0 }
  0x76   : > { %290 = sbr.rel (%p2547_p0) target bundleno = 1925 (0x785), region = 48  ;;  %s1449_s17 = sshll.u32 (!%p2547_p0), %s2364_s8, 3 }
  0x77   : > { %s293_s21 = scalar_lea.sflag (!%p2547_p0), [#allocation3], %s2364_s8  ;;  %s296_s16 = scalar_lea.vmem (!%p2547_p0), [#allocation2], %s1449_s17 }
  0x7d   : > { %2085 = dma.done.wait (%p2548_p9), %s293_s21, 128  }
  0x7e   : > { %2087 = vsyncadd (%p2548_p9), %s293_s21, 4294967168  ;;  %p2549_p11 = scmp.eq.s32.totalorder %s2186_s28, 0 }
  0x80   : > { %2089 = dma.done.wait (%p2549_p11), [#allocation6], 8192   ;;  %p2550_p8 = pmov %p2549_p11 }
  0x82   : > { %2091 = vsyncadd (%p2550_p8), [#allocation6], 4294959104  ;;  %p2551_p13 = pmov %p2550_p8 }
  0x83   : > { %p2552_p6 = pmov %p2550_p8 }
  0x84   : > { %2093 = dma.done.wait (%p2551_p13), [#allocation9], 1024  }
  0x85   : > { %2095 = vsyncadd (%p2552_p6), [#allocation9], 4294966272  ;;  %v2122_v0 = vmov 0.0   ;;  %v1852_v1 = vld [vmem:[#allocation5 + $0x40] sm:$0xff]   ;;  %v1854_v3 = vld [vmem:[#allocation5 + $0x48] sm:$0xff]   ;;  %vm2123_vm0 = vmmov 0  }
  0x86   : > { %1631 = vmatprep.subr.bf16.mxu1 %v2122_v0  ;;  %v1853_v2 = vld [vmem:[#allocation5] sm:$0xff]   ;;  %1546 = vmatprep.subr.bf16.mxu0 %v1852_v1  ;;  %v1855_v4 = vld [vmem:[#allocation5 + $0x8] sm:$0xff]   ;;  %v1856_v5 = vld [vmem:[#allocation5 + $0x50] sm:$0xff]   ;;  %s1542_s10 = sshll.u32 %s2186_s28, 7  ;;  %s338_s11 = scalar_lea.vmem [#allocation10], %s1449_s17 }
  0x87   : > { %1547 = vmatpush3.bf16.msra.mxu0 %v1853_v2  ;;  %v1857_v6 = vld [vmem:[#allocation5 + $0x10] sm:$0xff]   ;;  %v1858_v7 = vld [vmem:[#allocation5 + $0x58] sm:$0xff]   ;;  %v1860_v9 = vld [vmem:[#allocation5 + $0x60] sm:$0xff]   ;;  %1647 = vmatprep.mubr.msk.bf16.mxu1 %vm2123_vm0, %v2122_v0  ;;  %s1340_s14 = sshll.u32 %s338_s11, 4  ;;  %s2482_s15 = scalar_lea.hbm %s2533_s7, %s1542_s10  ;;  %s2484_s14 = int_to_ptr.vmem [resolvable:$true] %s1340_s14 }
  0x88   : > { %1548 = vmatprep.subr.bf16.mxu0 %v1854_v3  ;;  %v1859_v8 = vld [vmem:[#allocation5 + $0x18] sm:$0xff]   ;;  %v1861_v10 = vld [vmem:[#allocation5 + $0x20] sm:$0xff]   ;;  %v1862_v11 = vld [vmem:[#allocation5 + $0x68] sm:$0xff]   ;;  %s1327_s28 = scalar_lea.sflag [#allocation4], %s2364_s8  ;;  %s2040_s29 = scalar_lea.vmem %s2484_s14, 128 }
  0x89   : > { %v340_v12 = vld [vmem:[%s296_s16] sm:$0xff]  ;;  %v1870_v14 = vld [vmem:[#allocation7] sm:$0xff]   ;;  %v1863_v15 = vld [vmem:[#allocation5 + $0x28] sm:$0xff]   ;;  %p2041_p10 = scmp.ne.s32.totalorder %s2484_s14, %s2040_s29  ;;  %s2124_s17 = smov [#allocation10]  }
  0x8a   : > { %v1456_v13 = vcombine.high %v340_v12, %v340_v12  ;;  %v1864_v16 = vld [vmem:[#allocation5 + $0x70] sm:$0xff]   ;;  %1632 = vmatpush3.bf16.msra.mxu1 %v1870_v14  ;;  %v1871_v17 = vld [vmem:[#allocation7 + $0x8] sm:$0xff]   ;;  %v1866_v19 = vld [vmem:[#allocation5 + $0x78] sm:$0xff]   ;;  %v1455_v23 = vcombine.low %v340_v12, %v340_v12  ;;  %s2044_s12 = sshll.u32 %s2124_s17, 4  ;;  %s2045_s12 = int_to_ptr.vmem [resolvable:$false] %s2044_s12 }
  0x8b   : > { %1549 = vmatpush3.bf16.msra.mxu0 %v1855_v4  ;;  %v1865_v18 = vld [vmem:[#allocation5 + $0x30] sm:$0xff]   ;;  %1633 = vmatprep.subr.bf16.mxu1 %v2122_v0  ;;  %v1867_v21 = vld [vmem:[#allocation5 + $0x38] sm:$0xff]   ;;  %v1874_v24 = vld [vmem:[#allocation7 + $0x20] sm:$0xff]   ;;  %p2042_p3 = pnand %p2041_p10, %p2319_p5  ;;  %s2046_s21 = scalar_lea.vmem %s2045_s12, 256 }
  0x8c   : > { %1550 = vmatprep.subr.bf16.mxu0 %v1856_v5  ;;  %515 = vmatprep.mubr.bf16.mxu0 %v1456_v13  ;;  %v1872_v20 = vld [vmem:[#allocation7 + $0x10] sm:$0xff]   ;;  %v1873_v22 = vld [vmem:[#allocation7 + $0x18] sm:$0xff]   ;;  %v1875_v25 = vld [vmem:[#allocation7 + $0x28] sm:$0xff]   ;;  %p2047_p12 = scmp.lt.s32.totalorder %s2484_s14, %s2045_s12  ;;  %p2048_p1 = scmp.lt.s32.totalorder %s2046_s21, %s2040_s29 }
  0x8d   : > { %v1876_v26 = vld [vmem:[#allocation7 + $0x30] sm:$0xff]   ;;  %v1877_v27 = vld [vmem:[#allocation7 + $0x38] sm:$0xff]   ;;  %v1878_v28 = vld [vmem:[#allocation7 + $0x40] sm:$0xff]   ;;  %p2043_p7 = pneg %p2042_p3 }
  0x8e   : > { %1634 = vmatpush3.bf16.msra.mxu1 %v1871_v17  ;;  %v1879_v29 = vld [vmem:[#allocation7 + $0x48] sm:$0xff]   ;;  %v1880_v30 = vld [vmem:[#allocation7 + $0x50] sm:$0xff]   ;;  %v1881_v31 = vld [vmem:[#allocation7 + $0x58] sm:$0xff]   ;;  %p2049_p2 = por %p2048_p1, %p2047_p12 }
  0x8f   : > { %1551 = vmatpush3.bf16.msra.mxu0 %v1857_v6  ;;  %1635 = vmatprep.subr.bf16.mxu1 %v2122_v0  ;;  %v1882_v32 = vld [vmem:[#allocation7 + $0x60] sm:$0xff]   ;;  %v1883_v33 = vld [vmem:[#allocation7 + $0x68] sm:$0xff]   ;;  %v1454_v35 = vld [vmem:[%s2528_s2] ss:$0 sm:$0xff] }
  0x90   : > { %1552 = vmatprep.subr.bf16.mxu0 %v1858_v7  ;;  %v1884_v43 = vld [vmem:[#allocation7 + $0x70] sm:$0xff]   ;;  %v1885_v44 = vld [vmem:[#allocation7 + $0x78] sm:$0xff]   ;;  %v1886_v45 = vld [vmem:[#allocation7 + $0x80] sm:$0xff]   ;;  %p2050_p4 = pnand %p2049_p2, %p2043_p7 }
  0x91   : > { %v1887_v46 = vld [vmem:[#allocation7 + $0x88] sm:$0xff]   ;;  %v1888_v47 = vld [vmem:[#allocation7 + $0x90] sm:$0xff]   ;;  %v1889_v48 = vld [vmem:[#allocation7 + $0x98] sm:$0xff]  }
  0x92   : > { %1636 = vmatpush3.bf16.msra.mxu1 %v1872_v20  ;;  %v1890_v49 = vld [vmem:[#allocation7 + $0xa0] sm:$0xff]   ;;  %v1891_v50 = vld [vmem:[#allocation7 + $0xa8] sm:$0xff]   ;;  %v1473_v51 = vld [vmem:[%s2530_s4] ss:$0 sm:$0xff] }
  0x93   : > { %1553 = vmatpush3.bf16.msra.mxu0 %v1859_v8  ;;  %1637 = vmatprep.subr.bf16.mxu1 %v2122_v0  ;;  %v1892_v59 = vld [vmem:[#allocation7 + $0xb0] sm:$0xff]   ;;  %v1893_v60 = vld [vmem:[#allocation7 + $0xb8] sm:$0xff]   ;;  %v1894_v61 = vld [vmem:[#allocation7 + $0xc0] sm:$0xff]  }
  0x94   : > { %1554 = vmatprep.subr.bf16.mxu0 %v1860_v9  ;;  %v1895_v62 = vld [vmem:[#allocation7 + $0xc8] sm:$0xff]   ;;  %v1896_v63 = vld [vmem:[#allocation7 + $0xd0] sm:$0xff]   ;;  %v1897_v1 = vld [vmem:[#allocation7 + $0xd8] sm:$0xff]  }
  0x95   : > { %v1898_v2 = vld [vmem:[#allocation7 + $0xe0] sm:$0xff]   ;;  %v1899_v3 = vld [vmem:[#allocation7 + $0xe8] sm:$0xff]   ;;  %v1483_v4 = vld [vmem:[%s2530_s4 + $0x1] ss:$0 sm:$0xff] }
  0x96   : > { %1638 = vmatpush3.bf16.msra.mxu1 %v1873_v22  ;;  %v1900_v12 = vld [vmem:[#allocation7 + $0xf0] sm:$0xff]   ;;  %v1901_v13 = vld [vmem:[#allocation7 + $0xf8] sm:$0xff]   ;;  %v1902_v14 = vld [vmem:[#allocation7 + $0x100] sm:$0xff]  }
  0x97   : > { %1555 = vmatpush3.bf16.msra.mxu0 %v1861_v10  ;;  %1639 = vmatprep.subr.bf16.mxu1 %v2122_v0  ;;  %v1905_v17 = vld [vmem:[#allocation7 + $0x118] sm:$0xff]   ;;  %v1493_v20 = vld [vmem:[%s2530_s4 + $0x2] ss:$0 sm:$0xff] }
  0x98   : > { %1556 = vmatprep.subr.bf16.mxu0 %v1862_v11 }
  0x9a   : > { %1640 = vmatpush3.bf16.msra.mxu1 %v1874_v24 }
  0x9b   : > { %1557 = vmatpush3.bf16.msra.mxu0 %v1863_v15  ;;  %1641 = vmatprep.subr.bf16.mxu1 %v2122_v0  ;;  %v1903_v15 = vld [vmem:[#allocation7 + $0x108] sm:$0xff]  }
  0x9c   : > { %1558 = vmatprep.subr.bf16.mxu0 %v1864_v16  ;;  %v1904_v16 = vld [vmem:[#allocation7 + $0x110] sm:$0xff]  }
  0x9e   : > { %1642 = vmatpush3.bf16.msra.mxu1 %v1875_v25 }
  0x9f   : > { %1559 = vmatpush3.bf16.msra.mxu0 %v1865_v18  ;;  %1643 = vmatprep.subr.bf16.mxu1 %v2122_v0  ;;  %v1906_v18 = vld [vmem:[#allocation7 + $0x120] sm:$0xff]  }
  0xa0   : > { %1560 = vmatprep.subr.bf16.mxu0 %v1866_v19  ;;  %v1907_v19 = vld [vmem:[#allocation7 + $0x128] sm:$0xff]  }
  0xa2   : > { %1644 = vmatpush3.bf16.msra.mxu1 %v1876_v26 }
  0xa3   : > { %1561 = vmatpush3.bf16.msra.mxu0 %v1867_v21  ;;  %1645 = vmatprep.subr.bf16.mxu1 %v2122_v0 }
  0xa4   : > { %1651 = vmatprep.subr.bf16.mxu0 %v2122_v0 }
  0xa6   : > { %516 = vmatmul.mubr.bf16.vlgmr.msra.gmra.mrb[0].mxu0 %v1455_v23  ;;  %1646 = vmatpush3.bf16.msra.mxu1 %v1877_v27 }
  0xa7   : > { %1671 = vmatprep.subr.bf16.mxu1 %v2122_v0  ;;  %1667 = vmatprep.mubr.msk.bf16.mxu0 %vm2123_vm0, %v2122_v0 }
  0xa8   : > { %1652 = vmatpush3.bf16.msra.mxu0 %v1878_v28  ;;  %v1908_v28 = vld [vmem:[#allocation7 + $0x130] sm:$0xff]  }
  0xa9   : > { %1653 = vmatprep.subr.bf16.mxu0 %v2122_v0 }
  0xac   : > { %1654 = vmatpush3.bf16.msra.mxu0 %v1879_v29  ;;  %v1909_v29 = vld [vmem:[#allocation7 + $0x138] sm:$0xff]  }
  0xad   : > { %1655 = vmatprep.subr.bf16.mxu0 %v2122_v0 }
  0xb0   : > { %1656 = vmatpush3.bf16.msra.mxu0 %v1880_v30  ;;  %v1910_v30 = vld [vmem:[#allocation7 + $0x140] sm:$0xff]  }
  0xb1   : > { %1657 = vmatprep.subr.bf16.mxu0 %v2122_v0 }
  0xb4   : > { %1658 = vmatpush3.bf16.msra.mxu0 %v1881_v31  ;;  %v1911_v31 = vld [vmem:[#allocation7 + $0x148] sm:$0xff]  }
  0xb5   : > { %1659 = vmatprep.subr.bf16.mxu0 %v2122_v0 }
  0xb8   : > { %1660 = vmatpush3.bf16.msra.mxu0 %v1882_v32  ;;  %v1912_v32 = vld [vmem:[#allocation7 + $0x150] sm:$0xff]  }
  0xb9   : > { %1661 = vmatprep.subr.bf16.mxu0 %v2122_v0 }
  0xbc   : > { %1662 = vmatpush3.bf16.msra.mxu0 %v1883_v33  ;;  %v1913_v33 = vld [vmem:[#allocation7 + $0x158] sm:$0xff]  }
  0xbd   : > { %1663 = vmatprep.subr.bf16.mxu0 %v2122_v0 }
  0xc0   : > { %1664 = vmatpush3.bf16.msra.mxu0 %v1884_v43 }
  0xc1   : > { %1665 = vmatprep.subr.bf16.mxu0 %v2122_v0 }
  0xc4   : > { %1666 = vmatpush3.bf16.msra.mxu0 %v1885_v44  ;;  %v1916_v44 = vld [vmem:[#allocation7 + $0x170] sm:$0xff]  }
  0xc5   : > { %1691 = vmatprep.subr.bf16.mxu0 %v2122_v0 }
 0x179   : > { %v1562_v34 = vpop.f32.mrb[0].mxu0 }
 0x17a   : > { %v1563_v36 = vpop.f32.mrb[1].mxu0 }
 0x17b   : > { %v1564_v37 = vadd.f32 %v1563_v36, %v1562_v34  ;;  %v1565_v38 = vpop.f32.mrb[2].mxu0  ;;  %v1914_v34 = vld [vmem:[#allocation7 + $0x160] sm:$0xff]   ;;  %v1503_v36 = vld [vmem:[%s2530_s4 + $0x3] ss:$0 sm:$0xff] }
 0x17c   : > { %v1566_v39 = vpop.f32.mrb[3].mxu0 }
 0x17d   : > { %v518_v40 = vadd.f32 %v1564_v37, %v1454_v35  ;;  %v1915_v35 = vld [vmem:[#allocation7 + $0x168] sm:$0xff]  }
 0x17f   : > { %v523_v41 = vmax.f32 %v518_v40, 0.0 }
 0x181   : > { %v524_v42 = vpack.c.bf16 %v523_v41, %v523_v41 }
 0x183   : > { %1648 = vmatmul.mubr.bf16.vlgmr.msra.gmra.mrb[0].mxu1 %v524_v42 }
 0x184   : > { %1687 = vmatprep.mubr.msk.bf16.mxu1 %vm2123_vm0, %v2122_v0  ;;  %1672 = vmatpush3.bf16.msra.mxu1 %v1886_v45  ;;  %v1917_v45 = vld [vmem:[#allocation7 + $0x178] sm:$0xff]  }
 0x185   : > { %1673 = vmatprep.subr.bf16.mxu1 %v2122_v0 }
 0x188   : > { %1674 = vmatpush3.bf16.msra.mxu1 %v1887_v46  ;;  %v1918_v46 = vld [vmem:[#allocation8] sm:$0xff]  }
 0x189   : > { %1675 = vmatprep.subr.bf16.mxu1 %v2122_v0 }
 0x18c   : > { %1676 = vmatpush3.bf16.msra.mxu1 %v1888_v47  ;;  %v1919_v47 = vld [vmem:[#allocation8 + $0x8] sm:$0xff]  }
 0x18d   : > { %1677 = vmatprep.subr.bf16.mxu1 %v2122_v0 }
 0x190   : > { %1678 = vmatpush3.bf16.msra.mxu1 %v1889_v48  ;;  %v1920_v48 = vld [vmem:[#allocation8 + $0x10] sm:$0xff]  }
 0x191   : > { %1679 = vmatprep.subr.bf16.mxu1 %v2122_v0 }
 0x194   : > { %1680 = vmatpush3.bf16.msra.mxu1 %v1890_v49  ;;  %v1921_v49 = vld [vmem:[#allocation8 + $0x18] sm:$0xff]  }
 0x195   : > { %1681 = vmatprep.subr.bf16.mxu1 %v2122_v0 }
 0x198   : > { %1682 = vmatpush3.bf16.msra.mxu1 %v1891_v50  ;;  %v1922_v50 = vld [vmem:[#allocation8 + $0x20] sm:$0xff]  }
 0x199   : > { %1683 = vmatprep.subr.bf16.mxu1 %v2122_v0 }
 0x19c   : > { %1684 = vmatpush3.bf16.msra.mxu1 %v1892_v59 }
 0x19d   : > { %1685 = vmatprep.subr.bf16.mxu1 %v2122_v0 }
 0x1a0   : > { %1686 = vmatpush3.bf16.msra.mxu1 %v1893_v60  ;;  %v1924_v60 = vld [vmem:[#allocation8 + $0x30] sm:$0xff]  }
 0x1a1   : > { %1711 = vmatprep.subr.bf16.mxu1 %v2122_v0 }
 0x256   : > { %v630_v52 = vpop.f32.mrb[0].mxu1 }
 0x257   : > { %v631_v53 = vadd.f32 %v1473_v51, %v630_v52  ;;  %v1649_v54 = vpop.f32.mrb[1].mxu1  ;;  %v1923_v51 = vld [vmem:[#allocation8 + $0x28] sm:$0xff]   ;;  %v1513_v52 = vld [vmem:[%s2530_s4 + $0x4] ss:$0 sm:$0xff] }
 0x258   : > { %v633_v55 = vpop.f32.mrb[2].mxu1 }
 0x259   : > { %v636_v56 = vmax.f32 %v631_v53, 0.0  ;;  %v1650_v57 = vpop.f32.mrb[3].mxu1 }
 0x25b   : > { %v637_v58 = vpack.c.bf16 %v636_v56, %v636_v56 }
 0x25d   : > { %1668 = vmatmul.mubr.bf16.vlgmr.msra.gmra.mrb[4].mxu0 %v637_v58 }
 0x25e   : > { %1707 = vmatprep.mubr.msk.bf16.mxu0 %vm2123_vm0, %v2122_v0  ;;  %1692 = vmatpush3.bf16.msra.mxu0 %v1894_v61  ;;  %v1925_v61 = vld [vmem:[#allocation8 + $0x38] sm:$0xff]  }
 0x25f   : > { %1693 = vmatprep.subr.bf16.mxu0 %v2122_v0 }
 0x262   : > { %1694 = vmatpush3.bf16.msra.mxu0 %v1895_v62  ;;  %v1523_v62 = vld [vmem:[%s2530_s4 + $0x5] ss:$0 sm:$0xff] }
 0x263   : > { %1695 = vmatprep.subr.bf16.mxu0 %v2122_v0 }
 0x266   : > { %1696 = vmatpush3.bf16.msra.mxu0 %v1896_v63 }
 0x267   : > { %1697 = vmatprep.subr.bf16.mxu0 %v2122_v0 }
 0x26a   : > { %1698 = vmatpush3.bf16.msra.mxu0 %v1897_v1 }
 0x26b   : > { %1699 = vmatprep.subr.bf16.mxu0 %v2122_v0 }
 0x26e   : > { %1700 = vmatpush3.bf16.msra.mxu0 %v1898_v2 }
 0x26f   : > { %1701 = vmatprep.subr.bf16.mxu0 %v2122_v0 }
 0x272   : > { %1702 = vmatpush3.bf16.msra.mxu0 %v1899_v3 }
 0x273   : > { %1703 = vmatprep.subr.bf16.mxu0 %v2122_v0 }
 0x276   : > { %1704 = vmatpush3.bf16.msra.mxu0 %v1900_v12 }
 0x277   : > { %1705 = vmatprep.subr.bf16.mxu0 %v2122_v0 }
 0x27a   : > { %1706 = vmatpush3.bf16.msra.mxu0 %v1901_v13 }
 0x27b   : > { %1731 = vmatprep.subr.bf16.mxu0 %v2122_v0 }
 0x330   : > { %v745_v5 = vpop.f32.mrb[4].mxu0 }
 0x331   : > { %v746_v6 = vadd.f32 %v1483_v4, %v745_v5  ;;  %v1669_v7 = vpop.f32.mrb[5].mxu0 }
 0x332   : > { %v748_v8 = vpop.f32.mrb[6].mxu0  ;;  %v1532_v7 = vld [vmem:[%s2532_s6] ss:$0 sm:$0xff] }
 0x333   : > { %v751_v9 = vmax.f32 %v746_v6, 0.0  ;;  %v1670_v10 = vpop.f32.mrb[7].mxu0 }
 0x335   : > { %v752_v11 = vpack.c.bf16 %v751_v9, %v751_v9 }
 0x337   : > { %1688 = vmatmul.mubr.bf16.vlgmr.msra.gmra.mrb[4].mxu1 %v752_v11 }
 0x338   : > { %1727 = vmatprep.mubr.msk.bf16.mxu1 %vm2123_vm0, %v2122_v0  ;;  %1712 = vmatpush3.bf16.msra.mxu1 %v1902_v14 }
 0x339   : > { %1713 = vmatprep.subr.bf16.mxu1 %v2122_v0 }
 0x33c   : > { %1714 = vmatpush3.bf16.msra.mxu1 %v1903_v15 }
 0x33d   : > { %1715 = vmatprep.subr.bf16.mxu1 %v2122_v0 }
 0x340   : > { %1716 = vmatpush3.bf16.msra.mxu1 %v1904_v16 }
 0x341   : > { %1717 = vmatprep.subr.bf16.mxu1 %v2122_v0 }
 0x344   : > { %1718 = vmatpush3.bf16.msra.mxu1 %v1905_v17 }
 0x345   : > { %1719 = vmatprep.subr.bf16.mxu1 %v2122_v0 }
 0x348   : > { %1720 = vmatpush3.bf16.msra.mxu1 %v1906_v18 }
 0x349   : > { %1721 = vmatprep.subr.bf16.mxu1 %v2122_v0 }
 0x34c   : > { %1722 = vmatpush3.bf16.msra.mxu1 %v1907_v19 }
 0x34d   : > { %1723 = vmatprep.subr.bf16.mxu1 %v2122_v0 }
 0x350   : > { %1724 = vmatpush3.bf16.msra.mxu1 %v1908_v28 }
 0x351   : > { %1725 = vmatprep.subr.bf16.mxu1 %v2122_v0 }
 0x354   : > { %1726 = vmatpush3.bf16.msra.mxu1 %v1909_v29 }
 0x355   : > { %1751 = vmatprep.subr.bf16.mxu1 %v2122_v0 }
 0x40a   : > { %v860_v21 = vpop.f32.mrb[4].mxu1 }
 0x40b   : > { %v861_v22 = vadd.f32 %v1493_v20, %v860_v21  ;;  %v1689_v23 = vpop.f32.mrb[5].mxu1 }
 0x40c   : > { %v863_v24 = vpop.f32.mrb[6].mxu1 }
 0x40d   : > { %v866_v25 = vmax.f32 %v861_v22, 0.0  ;;  %v1690_v26 = vpop.f32.mrb[7].mxu1 }
 0x40f   : > { %v867_v27 = vpack.c.bf16 %v866_v25, %v866_v25 }
 0x411   : > { %1708 = vmatmul.mubr.bf16.vlgmr.msra.gmra.mrb[8].mxu0 %v867_v27 }
 0x412   : > { %1747 = vmatprep.mubr.msk.bf16.mxu0 %vm2123_vm0, %v2122_v0  ;;  %1732 = vmatpush3.bf16.msra.mxu0 %v1910_v30 }
 0x413   : > { %1733 = vmatprep.subr.bf16.mxu0 %v2122_v0 }
 0x416   : > { %1734 = vmatpush3.bf16.msra.mxu0 %v1911_v31 }
 0x417   : > { %1735 = vmatprep.subr.bf16.mxu0 %v2122_v0 }
 0x41a   : > { %1736 = vmatpush3.bf16.msra.mxu0 %v1912_v32 }
 0x41b   : > { %1737 = vmatprep.subr.bf16.mxu0 %v2122_v0 }
 0x41e   : > { %1738 = vmatpush3.bf16.msra.mxu0 %v1913_v33 }
 0x41f   : > { %1739 = vmatprep.subr.bf16.mxu0 %v2122_v0 }
 0x422   : > { %1740 = vmatpush3.bf16.msra.mxu0 %v1914_v34 }
 0x423   : > { %1741 = vmatprep.subr.bf16.mxu0 %v2122_v0 }
 0x426   : > { %1742 = vmatpush3.bf16.msra.mxu0 %v1915_v35 }
 0x427   : > { %1743 = vmatprep.subr.bf16.mxu0 %v2122_v0 }
 0x42a   : > { %1744 = vmatpush3.bf16.msra.mxu0 %v1916_v44 }
 0x42b   : > { %1745 = vmatprep.subr.bf16.mxu0 %v2122_v0 }
 0x42e   : > { %1746 = vmatpush3.bf16.msra.mxu0 %v1917_v45 }
 0x4e4   : > { %v975_v37 = vpop.f32.mrb[8].mxu0 }
 0x4e5   : > { %v976_v38 = vadd.f32 %v1503_v36, %v975_v37  ;;  %v1709_v39 = vpop.f32.mrb[9].mxu0 }
 0x4e6   : > { %v978_v40 = vpop.f32.mrb[10].mxu0 }
 0x4e7   : > { %v981_v41 = vmax.f32 %v976_v38, 0.0  ;;  %v1710_v42 = vpop.f32.mrb[11].mxu0 }
 0x4e9   : > { %v982_v43 = vpack.c.bf16 %v981_v41, %v981_v41 }
 0x4eb   : > { %1728 = vmatmul.mubr.bf16.vlgmr.msra.gmra.mrb[8].mxu1 %v982_v43 }
 0x4ec   : > { %1767 = vmatprep.mubr.msk.bf16.mxu1 %vm2123_vm0, %v2122_v0  ;;  %1752 = vmatpush3.bf16.msra.mxu1 %v1918_v46 }
 0x4ed   : > { %1753 = vmatprep.subr.bf16.mxu1 %v2122_v0 }
 0x4f0   : > { %1754 = vmatpush3.bf16.msra.mxu1 %v1919_v47 }
 0x4f1   : > { %1755 = vmatprep.subr.bf16.mxu1 %v2122_v0 }
 0x4f4   : > { %1756 = vmatpush3.bf16.msra.mxu1 %v1920_v48 }
 0x4f5   : > { %1757 = vmatprep.subr.bf16.mxu1 %v2122_v0 }
 0x4f8   : > { %1758 = vmatpush3.bf16.msra.mxu1 %v1921_v49 }
 0x4f9   : > { %1759 = vmatprep.subr.bf16.mxu1 %v2122_v0 }
 0x4fc   : > { %1760 = vmatpush3.bf16.msra.mxu1 %v1922_v50 }
 0x4fd   : > { %1761 = vmatprep.subr.bf16.mxu1 %v2122_v0 }
 0x500   : > { %1762 = vmatpush3.bf16.msra.mxu1 %v1923_v51 }
 0x501   : > { %1763 = vmatprep.subr.bf16.mxu1 %v2122_v0 }
 0x504   : > { %1764 = vmatpush3.bf16.msra.mxu1 %v1924_v60 }
 0x505   : > { %1765 = vmatprep.subr.bf16.mxu1 %v2122_v0 }
 0x508   : > { %1766 = vmatpush3.bf16.msra.mxu1 %v1925_v61 }
 0x5be   : > { %v1090_v53 = vpop.f32.mrb[8].mxu1 }
 0x5bf   : > { %v1091_v54 = vadd.f32 %v1513_v52, %v1090_v53  ;;  %v1729_v55 = vpop.f32.mrb[9].mxu1 }
 0x5c0   : > { %v1093_v56 = vpop.f32.mrb[10].mxu1 }
 0x5c1   : > { %v1096_v57 = vmax.f32 %v1091_v54, 0.0  ;;  %v1730_v58 = vpop.f32.mrb[11].mxu1 }
 0x5c3   : > { %v1097_v59 = vpack.c.bf16 %v1096_v57, %v1096_v57 }
 0x5c5   : > { %1748 = vmatmul.mubr.bf16.vlgmr.msra.gmra.mrb[12].mxu0 %v1097_v59 }
 0x698   : > { %v1205_v63 = vpop.f32.mrb[12].mxu0 }
 0x699   : > { %v1206_v1 = vadd.f32 %v1523_v62, %v1205_v63  ;;  %v1749_v2 = vpop.f32.mrb[13].mxu0 }
 0x69a   : > { %v1208_v3 = vpop.f32.mrb[14].mxu0 }
 0x69b   : > { %v1211_v4 = vmax.f32 %v1206_v1, 0.0  ;;  %v1750_v5 = vpop.f32.mrb[15].mxu0 }
 0x69d   : > { %v1212_v6 = vpack.c.bf16 %v1211_v4, %v1211_v4 }
 0x69f   : > { %1768 = vmatmul.mubr.bf16.vlgmr.msra.gmra.mrb[12].mxu1 %v1212_v6 }
 0x772   : > { %v1318_v0 = vpop.f32.mrb[12].mxu1 }
 0x773   : > { %v1319_v8 = vadd.f32 %v1532_v7, %v1318_v0  ;;  %v1769_v9 = vpop.f32.mrb[13].mxu1 }
 0x774   : > { %v1321_v10 = vpop.f32.mrb[14].mxu1 }
 0x775   : > { %v1324_v11 = vmax.f32 %v1319_v8, 0.0  ;;  %v1770_v12 = vpop.f32.mrb[15].mxu1 }
 0x777   : > { %1325 = vst [vmem:[%s338_s11] sm:$0xff] %v1324_v11 }
 0x778   : > { %2053 = shalt.err (!%p2050_p4)
}
 0x779   : > { %s2054_s8 = scalar_lea.hbm %s2482_s15, 128  ;;  %s2058_s9 = scalar_lea.hbm %s2533_s7, 256 }
 0x77a   : > { %p2055_p0 = scmp.ne.s32.totalorder %s2482_s15, %s2054_s8  ;;  %p2059_p8 = scmp.lt.u32.totalorder %s2482_s15, %s2533_s7 }
 0x77b   : > { %p2060_p13 = scmp.lt.u32.totalorder %s2058_s9, %s2054_s8  ;;  %p2062_p10 = scmp.lt.u32.totalorder %s2054_s8, %s2482_s15 }
 0x77c   : > { %p2056_p9 = pnand %p2055_p0, %p2319_p5 }
 0x77d   : > { %p2061_p6 = por %p2060_p13, %p2059_p8 }
 0x77e   : > { %p2057_p11 = pneg %p2056_p9 }
 0x77f   : > { %p2063_p3 = por %p2062_p10, %p2061_p6 }
 0x781   : > { %p2064_p7 = pnand %p2063_p3, %p2057_p11 }
 0x783   : > { %2067 = shalt.err (!%p2064_p7)
}
 0x784   : > { %1785 = dma.vmem_to_hbm [thread:$0]  (%p2319_p5), %s2484_s14, 128, %s2482_s15, %s1327_s28  }
 0x785 PF: > { %s2553_s11 = sld [smem:[#allocation15_spill]]  ;;  %s1352_s13 = sand.u32 1, %s2102_s24  }
 0x786   : > { %p2555_p1 = scmp.ge.s32.totalorder %s2114_s27, 2  ;;  %s1353_s20 = scalar_lea.sflag [#allocation4], %s1352_s13 }
 0x78b   : > { %p2554_p12 = scmp.ne.s32.totalorder %s2553_s11, 0 }
 0x78d   : > { %p1802_p2 = pnand %p2555_p1, %p2554_p12 }
 0x78f   : > { %2097 = dma.done.wait (!%p1802_p2), %s1353_s20, 128  }
 0x790   : > { %2099 = vsyncadd (!%p1802_p2), %s1353_s20, 4294967168  ;;  %p22_p4 = scmp.ge.s32.totalorder %s2305_s22, 4   ;;  %s2556_s24 = smov %s2106_s25 }
 0x791   : > { %s2557_s25 = smov %s2110_s26  ;;  %s2558_s26 = smov %s2315_s18 }
 0x792   : > { %s2559_s27 = smov %s2305_s22  ;;  %24 = sbr.rel (!%p22_p4) target bundleno = 7 (0x7), region = 115 }
 0x799   :  { %1358 = vsyncpa [#allocation3], 1 }
 0x79a   :  { %1360 = vsyncpa [#allocation3 + $0x1], 1 }
 0x79b   :  { %1361 = vsyncpa [#allocation6], 1 }
 0x79c   :  { %1362 = vsyncpa [#allocation9], 1 }
 0x79d   :  { %1363 = vsyncpa [#allocation4], 1 }
 0x79e   :  { %1365 = vsyncpa [#allocation4 + $0x1], 1 }

</bundles_post_ra>
